<compile_context>
chip_gen: v7x
topology: tpu7x:2x2x1
jax: 0.10.0
libtpu: 0.0.40
codegen_flags: <defaults>
</compile_context>

<pallas_src>
import jax
import jax.numpy as jnp
from jax.experimental import pallas as pl
from jax.experimental.pallas import tpu as pltpu

INPUT_SIZE = 28
HIDDEN = 64
OUT = 10
OUT_PAD = 128          # lane-dense output store; wrapper slices back to OUT

# Set to jnp.bfloat16 on v6e/v7x for ~3x fewer MXU passes on the serial per-step
# dot (keep preferred_element_type=f32).  Requires relaxing the correctness
# tolerance to ~2e-2, so the portable default stays f32.
DOT_DTYPE = jnp.float32


def _make_lstm_kernel(T, B_pad):
    H = HIDDEN

    def lstm_kernel(x_ref, wih_ref, whh_ref, b_ref, wout_ref, bout_ref,
                    out_ref, xproj_sc):
        # One batched MXU matmul for the input projections of all timesteps:
        # (T*B_pad, I) @ (I, 4H) + bias (bias add hoisted out of the loop).
        # Note: the zero-padded batch rows become nonzero here (bias) — they
        # carry junk through the recurrence and are sliced off in the wrapper.
        xproj_sc[...] = (
            jnp.dot(x_ref[...].astype(DOT_DTYPE), wih_ref[...].astype(DOT_DTYPE),
                    preferred_element_type=jnp.float32)
            + b_ref[...])

        whh = whh_ref[...].astype(DOT_DTYPE)          # (H, 4H), loop-invariant

        def step(t, carry):
            h, c = carry
            base = pl.multiple_of(t * B_pad, B_pad)   # sublane-aligned offset
            gates = (xproj_sc[pl.ds(base, B_pad), :]
                     + jnp.dot(h.astype(DOT_DTYPE), whh,
                               preferred_element_type=jnp.float32))

            # Gate axis is pre-permuted to [i, f, o, g]: one contiguous sigmoid
            # slab (3H = 192 lanes) + one tanh slab, instead of four 64-wide
            # lane-misaligned activations per step.
            sig = jax.nn.sigmoid(gates[:, :3 * H])
            g_g = jnp.tanh(gates[:, 3 * H:])
            i_g = sig[:, 0 * H:1 * H]
            f_g = sig[:, 1 * H:2 * H]
            o_g = sig[:, 2 * H:3 * H]

            c_new = f_g * c + i_g * g_g
            h_new = o_g * jnp.tanh(c_new)
            return (h_new, c_new)

        h0 = jnp.zeros((B_pad, H), jnp.float32)
        c0 = jnp.zeros((B_pad, H), jnp.float32)
        # Full unroll for short sequences (LLO visibility); partial unroll for
        # long ones to bound instruction count / vreg live ranges.
        h_last, _ = jax.lax.fori_loop(0, T, step, (h0, c0),
                                      unroll=True if T <= 8 else 8)

        # Fused final Linear, lane-dense 128-wide padded output store.
        out_ref[...] = (jnp.dot(h_last, wout_ref[...],
                                preferred_element_type=jnp.float32)
                        + bout_ref[...]).astype(out_ref.dtype)

    return lstm_kernel


def _reorder_gates(w):
    """Permute the leading 4H axis from PyTorch's [i, f, g, o] to [i, f, o, g]."""
    i, f, g, o = jnp.split(w, 4, axis=0)
    return jnp.concatenate([i, f, o, g], axis=0)


def prepare_params(params):
    """One-time (parameter-load-time) weight prep — keeps the per-call path clean."""
    H = HIDDEN
    wih_t = _reorder_gates(params["w_ih"]).T.astype(jnp.float32)      # (I, 4H)
    whh_t = _reorder_gates(params["w_hh"]).T.astype(jnp.float32)      # (H, 4H)
    bias = _reorder_gates(params["b_ih"] + params["b_hh"]).reshape(1, 4 * H)
    wout_p = jnp.zeros((H, OUT_PAD), jnp.float32).at[:, :OUT].set(
        params["w_out"].T)                                            # (H, 128)
    bout_p = jnp.zeros((1, OUT_PAD), jnp.float32).at[:, :OUT].set(
        params["b_out"].reshape(1, OUT))                              # (1, 128)
    return {"wih_t": wih_t, "whh_t": whh_t, "bias": bias,
            "wout_p": wout_p, "bout_p": bout_p}


def _lstm_pallas(x2d, prep, T, B_pad):
    """Zero-layout entry: x2d is the time-major (T*B_pad, I) slab."""
    H = HIDDEN
    I = x2d.shape[1]
    flops = (2 * T * B_pad * I * 4 * H          # batched input projection
             + 2 * T * B_pad * H * 4 * H        # recurrent dots
             + 2 * B_pad * H * OUT_PAD)         # final linear
    transcendentals = 5 * T * B_pad * H
    bytes_accessed = 4 * (T * B_pad * I + I * 4 * H + H * 4 * H + 4 * H
                          + H * OUT_PAD + OUT_PAD + B_pad * OUT_PAD)

    return pl.pallas_call(
        _make_lstm_kernel(T, B_pad),
        out_shape=jax.ShapeDtypeStruct((B_pad, OUT_PAD), jnp.float32),
        grid=(1,),
        in_specs=[
            pl.BlockSpec((T * B_pad, I), lambda i: (0, 0)),
            pl.BlockSpec((I, 4 * H), lambda i: (0, 0)),
            pl.BlockSpec((H, 4 * H), lambda i: (0, 0)),
            pl.BlockSpec((1, 4 * H), lambda i: (0, 0)),
            pl.BlockSpec((H, OUT_PAD), lambda i: (0, 0)),
            pl.BlockSpec((1, OUT_PAD), lambda i: (0, 0)),
        ],
        out_specs=pl.BlockSpec((B_pad, OUT_PAD), lambda i: (0, 0)),
        scratch_shapes=[
            pltpu.VMEM((T * B_pad, 4 * H), jnp.float32),   # xproj (all steps)
        ],
        compiler_params=pltpu.CompilerParams(
            dimension_semantics=("arbitrary",),
            vmem_limit_bytes=4 * 1024 * 1024),
        cost_estimate=pl.CostEstimate(
            flops=flops, transcendentals=transcendentals,
            bytes_accessed=bytes_accessed),
    )(x2d, prep["wih_t"], prep["whh_t"], prep["bias"],
      prep["wout_p"], prep["bout_p"])


@jax.jit
def rnn_forward(x, prep):
    """Batch-first (B, T, I) forward matching the PyTorch module.  Jitted as a
    whole so the tiny time-major re-layout of x fuses into a single dispatch
    with the kernel.  Callers that already hold the time-major padded slab can
    call _lstm_pallas() directly with zero wrapper ops."""
    B, T, I = x.shape
    B_pad = max(8, -(-B // 8) * 8)
    x_tm = jnp.transpose(x, (1, 0, 2))                        # (T, B, I)
    x_p = jnp.pad(x_tm, ((0, 0), (0, B_pad - B), (0, 0)))     # (T, B_pad, I)
    x2d = x_p.reshape(T * B_pad, I)                           # (T*B_pad, I)
    return _lstm_pallas(x2d, prep, T, B_pad)[:B, :OUT]


def rnn_reference(x, params):
    """Pure-JAX reference matching PyTorch nn.LSTM (gate order i,f,g,o) + Linear."""
    B, T, I = x.shape
    wih_t = params["w_ih"].T
    whh_t = params["w_hh"].T
    bias = params["b_ih"] + params["b_hh"]

    def step(carry, x_t):
        h, c = carry
        gates = x_t @ wih_t + h @ whh_t + bias
        i_g, f_g, g_g, o_g = jnp.split(gates, 4, axis=-1)
        i_g = jax.nn.sigmoid(i_g)
        f_g = jax.nn.sigmoid(f_g)
        g_g = jnp.tanh(g_g)
        o_g = jax.nn.sigmoid(o_g)
        c = f_g * c + i_g * g_g
        h = o_g * jnp.tanh(c)
        return (h, c), None

    h0 = jnp.zeros((B, HIDDEN), jnp.float32)
    c0 = jnp.zeros((B, HIDDEN), jnp.float32)
    (h_last, _), _ = jax.lax.scan(step, (h0, c0), jnp.transpose(x, (1, 0, 2)))
    return h_last @ params["w_out"].T + params["b_out"]


def init_params(key):
    """Deterministic init mimicking PyTorch default U(-1/sqrt(H), 1/sqrt(H))."""
    ks = jax.random.split(key, 6)
    bound = 1.0 / jnp.sqrt(jnp.float32(HIDDEN))

    def u(k, shape):
        return jax.random.uniform(k, shape, jnp.float32, -bound, bound)

    return {
        "w_ih": u(ks[0], (4 * HIDDEN, INPUT_SIZE)),
        "w_hh": u(ks[1], (4 * HIDDEN, HIDDEN)),
        "b_ih": u(ks[2], (4 * HIDDEN,)),
        "b_hh": u(ks[3], (4 * HIDDEN,)),
        "w_out": u(ks[4], (OUT, HIDDEN)),
        "b_out": u(ks[5], (OUT,)),
    }


if __name__ == "__main__":
    key = jax.random.PRNGKey(0)
    k_param, k_x = jax.random.split(key)
    params = init_params(k_param)
    prep = prepare_params(params)          # one-time weight prep (NOT per call)

    B, T = 2, 8                            # small batch, short sequence
    x = jax.random.normal(k_x, (B, T, INPUT_SIZE), jnp.float32)

    out = jax.block_until_ready(rnn_forward(x, prep))
    ref = rnn_reference(x, params)

    assert out.shape == (B, OUT)
    assert jnp.allclose(out, ref, atol=1e-4, rtol=1e-4), (out, ref)

    print("KERNEL_OK")
</pallas_src>

<mosaic_0001>
module attributes {stable_mosaic.version = 11 : i64} {
  func.func @lstm_kernel(%arg0: i32, %arg1: memref<64x28xf32, #tpu.memory_space<vmem>>, %arg2: memref<28x256xf32, #tpu.memory_space<vmem>>, %arg3: memref<64x256xf32, #tpu.memory_space<vmem>>, %arg4: memref<1x256xf32, #tpu.memory_space<vmem>>, %arg5: memref<64x128xf32, #tpu.memory_space<vmem>>, %arg6: memref<1x128xf32, #tpu.memory_space<vmem>>, %arg7: memref<8x128xf32, #tpu.memory_space<vmem>>, %arg8: memref<64x256xf32, #tpu.memory_space<vmem>>) attributes {dimension_semantics = [#tpu.dimension_semantics<arbitrary>], iteration_bounds = array<i64: 1>, scalar_prefetch = 0 : i64, scratch_operands = 1 : i64, tpu.core_type = #tpu.core_type<tc>, window_params = [{pipeline_mode = #tpu.pipeline_mode<synchronous>, transform_indices = @transform_0, window_bounds = array<i64: 64, 28>}, {pipeline_mode = #tpu.pipeline_mode<synchronous>, transform_indices = @transform_1, window_bounds = array<i64: 28, 256>}, {pipeline_mode = #tpu.pipeline_mode<synchronous>, transform_indices = @transform_2, window_bounds = array<i64: 64, 256>}, {pipeline_mode = #tpu.pipeline_mode<synchronous>, transform_indices = @transform_3, window_bounds = array<i64: 1, 256>}, {pipeline_mode = #tpu.pipeline_mode<synchronous>, transform_indices = @transform_4, window_bounds = array<i64: 64, 128>}, {pipeline_mode = #tpu.pipeline_mode<synchronous>, transform_indices = @transform_5, window_bounds = array<i64: 1, 128>}, {pipeline_mode = #tpu.pipeline_mode<synchronous>, transform_indices = @transform_6, window_bounds = array<i64: 8, 128>}]} {
    %c0 = arith.constant 0 : index
    %c0_0 = arith.constant 0 : index
    %0 = vector.load %arg1[%c0, %c0_0] : memref<64x28xf32, #tpu.memory_space<vmem>>, vector<64x28xf32>
    %c0_1 = arith.constant 0 : index
    %c0_2 = arith.constant 0 : index
    %1 = vector.load %arg2[%c0_1, %c0_2] : memref<28x256xf32, #tpu.memory_space<vmem>>, vector<28x256xf32>
    %cst = arith.constant dense<0.000000e+00> : vector<64x256xf32>
    %2 = tpu.matmul %0, %1, %cst {dimension_numbers = #tpu.dot_dimension_numbers<[1], [0], [0], [1], [0, 0, 1, 1], [], []>} : vector<64x28xf32>, vector<28x256xf32>, vector<64x256xf32> -> vector<64x256xf32>
    %c0_3 = arith.constant 0 : index
    %c0_4 = arith.constant 0 : index
    %3 = vector.load %arg4[%c0_3, %c0_4] : memref<1x256xf32, #tpu.memory_space<vmem>>, vector<1x256xf32>
    %4 = vector.broadcast %3 : vector<1x256xf32> to vector<64x256xf32>
    %5 = arith.addf %2, %4 : vector<64x256xf32>
    %c0_5 = arith.constant 0 : index
    %c0_6 = arith.constant 0 : index
    %6 = vector.load %arg8[%c0_5, %c0_6] : memref<64x256xf32, #tpu.memory_space<vmem>>, vector<64x256xf32>
    tpu.vector_store %arg8[%c0_5, %c0_6], %5 {strides = array<i32>} : memref<64x256xf32, #tpu.memory_space<vmem>>, vector<64x256xf32>,
    %c0_7 = arith.constant 0 : index
    %c0_8 = arith.constant 0 : index
    %7 = vector.load %arg3[%c0_7, %c0_8] : memref<64x256xf32, #tpu.memory_space<vmem>>, vector<64x256xf32>
    %cst_9 = arith.constant 0.000000e+00 : f32
    %8 = vector.broadcast %cst_9 : f32 to vector<8x64xf32>
    %cst_10 = arith.constant 0.000000e+00 : f32
    %9 = vector.broadcast %cst_10 : f32 to vector<8x64xf32>
    %c0_i32 = arith.constant 0 : i32
    %c8_i32 = arith.constant 8 : i32
    %10 = arith.muli %c0_i32, %c8_i32 : i32
    %11 = tpu.assume_multiple %10, 8 : i32
    %12 = arith.index_cast %11 : i32 to index
    %c0_11 = arith.constant 0 : index
    %13 = vector.load %arg8[%12, %c0_11] : memref<64x256xf32, #tpu.memory_space<vmem>>, vector<8x256xf32>
    %cst_12 = arith.constant dense<0.000000e+00> : vector<8x256xf32>
    %14 = tpu.matmul %8, %7, %cst_12 {dimension_numbers = #tpu.dot_dimension_numbers<[1], [0], [0], [1], [0, 0, 1, 1], [], []>} : vector<8x64xf32>, vector<64x256xf32>, vector<8x256xf32> -> vector<8x256xf32>
    %15 = arith.addf %13, %14 : vector<8x256xf32>
    %16 = vector.extract_strided_slice %15 {offsets = [0, 0], sizes = [8, 192], strides = [1, 1]} : vector<8x256xf32> to vector<8x192xf32>
    %17 = arith.negf %16 : vector<8x192xf32>
    %18 = math.exp %17 : vector<8x192xf32>
    %cst_13 = arith.constant 1.000000e+00 : f32
    %19 = vector.broadcast %cst_13 : f32 to vector<8x192xf32>
    %20 = arith.addf %19, %18 : vector<8x192xf32>
    %21 = arith.divf %19, %20 : vector<8x192xf32>
    %22 = vector.extract_strided_slice %15 {offsets = [0, 192], sizes = [8, 64], strides = [1, 1]} : vector<8x256xf32> to vector<8x64xf32>
    %23 = math.tanh %22 : vector<8x64xf32>
    %24 = vector.extract_strided_slice %21 {offsets = [0, 0], sizes = [8, 64], strides = [1, 1]} : vector<8x192xf32> to vector<8x64xf32>
    %25 = vector.extract_strided_slice %21 {offsets = [0, 64], sizes = [8, 64], strides = [1, 1]} : vector<8x192xf32> to vector<8x64xf32>
    %26 = vector.extract_strided_slice %21 {offsets = [0, 128], sizes = [8, 64], strides = [1, 1]} : vector<8x192xf32> to vector<8x64xf32>
    %27 = arith.mulf %25, %9 : vector<8x64xf32>
    %28 = arith.mulf %24, %23 : vector<8x64xf32>
    %29 = arith.addf %27, %28 : vector<8x64xf32>
    %30 = math.tanh %29 : vector<8x64xf32>
    %31 = arith.mulf %26, %30 : vector<8x64xf32>
    %c1_i32 = arith.constant 1 : i32
    %c8_i32_14 = arith.constant 8 : i32
    %32 = arith.muli %c1_i32, %c8_i32_14 : i32
    %33 = tpu.assume_multiple %32, 8 : i32
    %34 = arith.index_cast %33 : i32 to index
    %c0_15 = arith.constant 0 : index
    %35 = vector.load %arg8[%34, %c0_15] : memref<64x256xf32, #tpu.memory_space<vmem>>, vector<8x256xf32>
    %cst_16 = arith.constant dense<0.000000e+00> : vector<8x256xf32>
    %36 = tpu.matmul %31, %7, %cst_16 {dimension_numbers = #tpu.dot_dimension_numbers<[1], [0], [0], [1], [0, 0, 1, 1], [], []>} : vector<8x64xf32>, vector<64x256xf32>, vector<8x256xf32> -> vector<8x256xf32>
    %37 = arith.addf %35, %36 : vector<8x256xf32>
    %38 = vector.extract_strided_slice %37 {offsets = [0, 0], sizes = [8, 192], strides = [1, 1]} : vector<8x256xf32> to vector<8x192xf32>
    %39 = arith.negf %38 : vector<8x192xf32>
    %40 = math.exp %39 : vector<8x192xf32>
    %cst_17 = arith.constant 1.000000e+00 : f32
    %41 = vector.broadcast %cst_17 : f32 to vector<8x192xf32>
    %42 = arith.addf %41, %40 : vector<8x192xf32>
    %43 = arith.divf %41, %42 : vector<8x192xf32>
    %44 = vector.extract_strided_slice %37 {offsets = [0, 192], sizes = [8, 64], strides = [1, 1]} : vector<8x256xf32> to vector<8x64xf32>
    %45 = math.tanh %44 : vector<8x64xf32>
    %46 = vector.extract_strided_slice %43 {offsets = [0, 0], sizes = [8, 64], strides = [1, 1]} : vector<8x192xf32> to vector<8x64xf32>
    %47 = vector.extract_strided_slice %43 {offsets = [0, 64], sizes = [8, 64], strides = [1, 1]} : vector<8x192xf32> to vector<8x64xf32>
    %48 = vector.extract_strided_slice %43 {offsets = [0, 128], sizes = [8, 64], strides = [1, 1]} : vector<8x192xf32> to vector<8x64xf32>
    %49 = arith.mulf %47, %29 : vector<8x64xf32>
    %50 = arith.mulf %46, %45 : vector<8x64xf32>
    %51 = arith.addf %49, %50 : vector<8x64xf32>
    %52 = math.tanh %51 : vector<8x64xf32>
    %53 = arith.mulf %48, %52 : vector<8x64xf32>
    %c2_i32 = arith.constant 2 : i32
    %c8_i32_18 = arith.constant 8 : i32
    %54 = arith.muli %c2_i32, %c8_i32_18 : i32
    %55 = tpu.assume_multiple %54, 8 : i32
    %56 = arith.index_cast %55 : i32 to index
    %c0_19 = arith.constant 0 : index
    %57 = vector.load %arg8[%56, %c0_19] : memref<64x256xf32, #tpu.memory_space<vmem>>, vector<8x256xf32>
    %cst_20 = arith.constant dense<0.000000e+00> : vector<8x256xf32>
    %58 = tpu.matmul %53, %7, %cst_20 {dimension_numbers = #tpu.dot_dimension_numbers<[1], [0], [0], [1], [0, 0, 1, 1], [], []>} : vector<8x64xf32>, vector<64x256xf32>, vector<8x256xf32> -> vector<8x256xf32>
    %59 = arith.addf %57, %58 : vector<8x256xf32>
    %60 = vector.extract_strided_slice %59 {offsets = [0, 0], sizes = [8, 192], strides = [1, 1]} : vector<8x256xf32> to vector<8x192xf32>
    %61 = arith.negf %60 : vector<8x192xf32>
    %62 = math.exp %61 : vector<8x192xf32>
    %cst_21 = arith.constant 1.000000e+00 : f32
    %63 = vector.broadcast %cst_21 : f32 to vector<8x192xf32>
    %64 = arith.addf %63, %62 : vector<8x192xf32>
    %65 = arith.divf %63, %64 : vector<8x192xf32>
    %66 = vector.extract_strided_slice %59 {offsets = [0, 192], sizes = [8, 64], strides = [1, 1]} : vector<8x256xf32> to vector<8x64xf32>
    %67 = math.tanh %66 : vector<8x64xf32>
    %68 = vector.extract_strided_slice %65 {offsets = [0, 0], sizes = [8, 64], strides = [1, 1]} : vector<8x192xf32> to vector<8x64xf32>
    %69 = vector.extract_strided_slice %65 {offsets = [0, 64], sizes = [8, 64], strides = [1, 1]} : vector<8x192xf32> to vector<8x64xf32>
    %70 = vector.extract_strided_slice %65 {offsets = [0, 128], sizes = [8, 64], strides = [1, 1]} : vector<8x192xf32> to vector<8x64xf32>
    %71 = arith.mulf %69, %51 : vector<8x64xf32>
    %72 = arith.mulf %68, %67 : vector<8x64xf32>
    %73 = arith.addf %71, %72 : vector<8x64xf32>
    %74 = math.tanh %73 : vector<8x64xf32>
    %75 = arith.mulf %70, %74 : vector<8x64xf32>
    %c3_i32 = arith.constant 3 : i32
    %c8_i32_22 = arith.constant 8 : i32
    %76 = arith.muli %c3_i32, %c8_i32_22 : i32
    %77 = tpu.assume_multiple %76, 8 : i32
    %78 = arith.index_cast %77 : i32 to index
    %c0_23 = arith.constant 0 : index
    %79 = vector.load %arg8[%78, %c0_23] : memref<64x256xf32, #tpu.memory_space<vmem>>, vector<8x256xf32>
    %cst_24 = arith.constant dense<0.000000e+00> : vector<8x256xf32>
    %80 = tpu.matmul %75, %7, %cst_24 {dimension_numbers = #tpu.dot_dimension_numbers<[1], [0], [0], [1], [0, 0, 1, 1], [], []>} : vector<8x64xf32>, vector<64x256xf32>, vector<8x256xf32> -> vector<8x256xf32>
    %81 = arith.addf %79, %80 : vector<8x256xf32>
    %82 = vector.extract_strided_slice %81 {offsets = [0, 0], sizes = [8, 192], strides = [1, 1]} : vector<8x256xf32> to vector<8x192xf32>
    %83 = arith.negf %82 : vector<8x192xf32>
    %84 = math.exp %83 : vector<8x192xf32>
    %cst_25 = arith.constant 1.000000e+00 : f32
    %85 = vector.broadcast %cst_25 : f32 to vector<8x192xf32>
    %86 = arith.addf %85, %84 : vector<8x192xf32>
    %87 = arith.divf %85, %86 : vector<8x192xf32>
    %88 = vector.extract_strided_slice %81 {offsets = [0, 192], sizes = [8, 64], strides = [1, 1]} : vector<8x256xf32> to vector<8x64xf32>
    %89 = math.tanh %88 : vector<8x64xf32>
    %90 = vector.extract_strided_slice %87 {offsets = [0, 0], sizes = [8, 64], strides = [1, 1]} : vector<8x192xf32> to vector<8x64xf32>
    %91 = vector.extract_strided_slice %87 {offsets = [0, 64], sizes = [8, 64], strides = [1, 1]} : vector<8x192xf32> to vector<8x64xf32>
    %92 = vector.extract_strided_slice %87 {offsets = [0, 128], sizes = [8, 64], strides = [1, 1]} : vector<8x192xf32> to vector<8x64xf32>
    %93 = arith.mulf %91, %73 : vector<8x64xf32>
    %94 = arith.mulf %90, %89 : vector<8x64xf32>
    %95 = arith.addf %93, %94 : vector<8x64xf32>
    %96 = math.tanh %95 : vector<8x64xf32>
    %97 = arith.mulf %92, %96 : vector<8x64xf32>
    %c4_i32 = arith.constant 4 : i32
    %c8_i32_26 = arith.constant 8 : i32
    %98 = arith.muli %c4_i32, %c8_i32_26 : i32
    %99 = tpu.assume_multiple %98, 8 : i32
    %100 = arith.index_cast %99 : i32 to index
    %c0_27 = arith.constant 0 : index
    %101 = vector.load %arg8[%100, %c0_27] : memref<64x256xf32, #tpu.memory_space<vmem>>, vector<8x256xf32>
    %cst_28 = arith.constant dense<0.000000e+00> : vector<8x256xf32>
    %102 = tpu.matmul %97, %7, %cst_28 {dimension_numbers = #tpu.dot_dimension_numbers<[1], [0], [0], [1], [0, 0, 1, 1], [], []>} : vector<8x64xf32>, vector<64x256xf32>, vector<8x256xf32> -> vector<8x256xf32>
    %103 = arith.addf %101, %102 : vector<8x256xf32>
    %104 = vector.extract_strided_slice %103 {offsets = [0, 0], sizes = [8, 192], strides = [1, 1]} : vector<8x256xf32> to vector<8x192xf32>
    %105 = arith.negf %104 : vector<8x192xf32>
    %106 = math.exp %105 : vector<8x192xf32>
    %cst_29 = arith.constant 1.000000e+00 : f32
    %107 = vector.broadcast %cst_29 : f32 to vector<8x192xf32>
    %108 = arith.addf %107, %106 : vector<8x192xf32>
    %109 = arith.divf %107, %108 : vector<8x192xf32>
    %110 = vector.extract_strided_slice %103 {offsets = [0, 192], sizes = [8, 64], strides = [1, 1]} : vector<8x256xf32> to vector<8x64xf32>
    %111 = math.tanh %110 : vector<8x64xf32>
    %112 = vector.extract_strided_slice %109 {offsets = [0, 0], sizes = [8, 64], strides = [1, 1]} : vector<8x192xf32> to vector<8x64xf32>
    %113 = vector.extract_strided_slice %109 {offsets = [0, 64], sizes = [8, 64], strides = [1, 1]} : vector<8x192xf32> to vector<8x64xf32>
    %114 = vector.extract_strided_slice %109 {offsets = [0, 128], sizes = [8, 64], strides = [1, 1]} : vector<8x192xf32> to vector<8x64xf32>
    %115 = arith.mulf %113, %95 : vector<8x64xf32>
    %116 = arith.mulf %112, %111 : vector<8x64xf32>
    %117 = arith.addf %115, %116 : vector<8x64xf32>
    %118 = math.tanh %117 : vector<8x64xf32>
    %119 = arith.mulf %114, %118 : vector<8x64xf32>
    %c5_i32 = arith.constant 5 : i32
    %c8_i32_30 = arith.constant 8 : i32
    %120 = arith.muli %c5_i32, %c8_i32_30 : i32
    %121 = tpu.assume_multiple %120, 8 : i32
    %122 = arith.index_cast %121 : i32 to index
    %c0_31 = arith.constant 0 : index
    %123 = vector.load %arg8[%122, %c0_31] : memref<64x256xf32, #tpu.memory_space<vmem>>, vector<8x256xf32>
    %cst_32 = arith.constant dense<0.000000e+00> : vector<8x256xf32>
    %124 = tpu.matmul %119, %7, %cst_32 {dimension_numbers = #tpu.dot_dimension_numbers<[1], [0], [0], [1], [0, 0, 1, 1], [], []>} : vector<8x64xf32>, vector<64x256xf32>, vector<8x256xf32> -> vector<8x256xf32>
    %125 = arith.addf %123, %124 : vector<8x256xf32>
    %126 = vector.extract_strided_slice %125 {offsets = [0, 0], sizes = [8, 192], strides = [1, 1]} : vector<8x256xf32> to vector<8x192xf32>
    %127 = arith.negf %126 : vector<8x192xf32>
    %128 = math.exp %127 : vector<8x192xf32>
    %cst_33 = arith.constant 1.000000e+00 : f32
    %129 = vector.broadcast %cst_33 : f32 to vector<8x192xf32>
    %130 = arith.addf %129, %128 : vector<8x192xf32>
    %131 = arith.divf %129, %130 : vector<8x192xf32>
    %132 = vector.extract_strided_slice %125 {offsets = [0, 192], sizes = [8, 64], strides = [1, 1]} : vector<8x256xf32> to vector<8x64xf32>
    %133 = math.tanh %132 : vector<8x64xf32>
    %134 = vector.extract_strided_slice %131 {offsets = [0, 0], sizes = [8, 64], strides = [1, 1]} : vector<8x192xf32> to vector<8x64xf32>
    %135 = vector.extract_strided_slice %131 {offsets = [0, 64], sizes = [8, 64], strides = [1, 1]} : vector<8x192xf32> to vector<8x64xf32>
    %136 = vector.extract_strided_slice %131 {offsets = [0, 128], sizes = [8, 64], strides = [1, 1]} : vector<8x192xf32> to vector<8x64xf32>
    %137 = arith.mulf %135, %117 : vector<8x64xf32>
    %138 = arith.mulf %134, %133 : vector<8x64xf32>
    %139 = arith.addf %137, %138 : vector<8x64xf32>
    %140 = math.tanh %139 : vector<8x64xf32>
    %141 = arith.mulf %136, %140 : vector<8x64xf32>
    %c6_i32 = arith.constant 6 : i32
    %c8_i32_34 = arith.constant 8 : i32
    %142 = arith.muli %c6_i32, %c8_i32_34 : i32
    %143 = tpu.assume_multiple %142, 8 : i32
    %144 = arith.index_cast %143 : i32 to index
    %c0_35 = arith.constant 0 : index
    %145 = vector.load %arg8[%144, %c0_35] : memref<64x256xf32, #tpu.memory_space<vmem>>, vector<8x256xf32>
    %cst_36 = arith.constant dense<0.000000e+00> : vector<8x256xf32>
    %146 = tpu.matmul %141, %7, %cst_36 {dimension_numbers = #tpu.dot_dimension_numbers<[1], [0], [0], [1], [0, 0, 1, 1], [], []>} : vector<8x64xf32>, vector<64x256xf32>, vector<8x256xf32> -> vector<8x256xf32>
    %147 = arith.addf %145, %146 : vector<8x256xf32>
    %148 = vector.extract_strided_slice %147 {offsets = [0, 0], sizes = [8, 192], strides = [1, 1]} : vector<8x256xf32> to vector<8x192xf32>
    %149 = arith.negf %148 : vector<8x192xf32>
    %150 = math.exp %149 : vector<8x192xf32>
    %cst_37 = arith.constant 1.000000e+00 : f32
    %151 = vector.broadcast %cst_37 : f32 to vector<8x192xf32>
    %152 = arith.addf %151, %150 : vector<8x192xf32>
    %153 = arith.divf %151, %152 : vector<8x192xf32>
    %154 = vector.extract_strided_slice %147 {offsets = [0, 192], sizes = [8, 64], strides = [1, 1]} : vector<8x256xf32> to vector<8x64xf32>
    %155 = math.tanh %154 : vector<8x64xf32>
    %156 = vector.extract_strided_slice %153 {offsets = [0, 0], sizes = [8, 64], strides = [1, 1]} : vector<8x192xf32> to vector<8x64xf32>
    %157 = vector.extract_strided_slice %153 {offsets = [0, 64], sizes = [8, 64], strides = [1, 1]} : vector<8x192xf32> to vector<8x64xf32>
    %158 = vector.extract_strided_slice %153 {offsets = [0, 128], sizes = [8, 64], strides = [1, 1]} : vector<8x192xf32> to vector<8x64xf32>
    %159 = arith.mulf %157, %139 : vector<8x64xf32>
    %160 = arith.mulf %156, %155 : vector<8x64xf32>
    %161 = arith.addf %159, %160 : vector<8x64xf32>
    %162 = math.tanh %161 : vector<8x64xf32>
    %163 = arith.mulf %158, %162 : vector<8x64xf32>
    %c7_i32 = arith.constant 7 : i32
    %c8_i32_38 = arith.constant 8 : i32
    %164 = arith.muli %c7_i32, %c8_i32_38 : i32
    %165 = tpu.assume_multiple %164, 8 : i32
    %166 = arith.index_cast %165 : i32 to index
    %c0_39 = arith.constant 0 : index
    %167 = vector.load %arg8[%166, %c0_39] : memref<64x256xf32, #tpu.memory_space<vmem>>, vector<8x256xf32>
    %cst_40 = arith.constant dense<0.000000e+00> : vector<8x256xf32>
    %168 = tpu.matmul %163, %7, %cst_40 {dimension_numbers = #tpu.dot_dimension_numbers<[1], [0], [0], [1], [0, 0, 1, 1], [], []>} : vector<8x64xf32>, vector<64x256xf32>, vector<8x256xf32> -> vector<8x256xf32>
    %169 = arith.addf %167, %168 : vector<8x256xf32>
    %170 = vector.extract_strided_slice %169 {offsets = [0, 0], sizes = [8, 192], strides = [1, 1]} : vector<8x256xf32> to vector<8x192xf32>
    %171 = arith.negf %170 : vector<8x192xf32>
    %172 = math.exp %171 : vector<8x192xf32>
    %cst_41 = arith.constant 1.000000e+00 : f32
    %173 = vector.broadcast %cst_41 : f32 to vector<8x192xf32>
    %174 = arith.addf %173, %172 : vector<8x192xf32>
    %175 = arith.divf %173, %174 : vector<8x192xf32>
    %176 = vector.extract_strided_slice %169 {offsets = [0, 192], sizes = [8, 64], strides = [1, 1]} : vector<8x256xf32> to vector<8x64xf32>
    %177 = math.tanh %176 : vector<8x64xf32>
    %178 = vector.extract_strided_slice %175 {offsets = [0, 0], sizes = [8, 64], strides = [1, 1]} : vector<8x192xf32> to vector<8x64xf32>
    %179 = vector.extract_strided_slice %175 {offsets = [0, 64], sizes = [8, 64], strides = [1, 1]} : vector<8x192xf32> to vector<8x64xf32>
    %180 = vector.extract_strided_slice %175 {offsets = [0, 128], sizes = [8, 64], strides = [1, 1]} : vector<8x192xf32> to vector<8x64xf32>
    %181 = arith.mulf %179, %161 : vector<8x64xf32>
    %182 = arith.mulf %178, %177 : vector<8x64xf32>
    %183 = arith.addf %181, %182 : vector<8x64xf32>
    %184 = math.tanh %183 : vector<8x64xf32>
    %185 = arith.mulf %180, %184 : vector<8x64xf32>
    %c8_i32_42 = arith.constant 8 : i32
    %c0_43 = arith.constant 0 : index
    %c0_44 = arith.constant 0 : index
    %186 = vector.load %arg5[%c0_43, %c0_44] : memref<64x128xf32, #tpu.memory_space<vmem>>, vector<64x128xf32>
    %cst_45 = arith.constant dense<0.000000e+00> : vector<8x128xf32>
    %187 = tpu.matmul %185, %186, %cst_45 {dimension_numbers = #tpu.dot_dimension_numbers<[1], [0], [0], [1], [0, 0, 1, 1], [], []>} : vector<8x64xf32>, vector<64x128xf32>, vector<8x128xf32> -> vector<8x128xf32>
    %c0_46 = arith.constant 0 : index
    %c0_47 = arith.constant 0 : index
    %188 = vector.load %arg6[%c0_46, %c0_47] : memref<1x128xf32, #tpu.memory_space<vmem>>, vector<1x128xf32>
    %189 = vector.broadcast %188 : vector<1x128xf32> to vector<8x128xf32>
    %190 = arith.addf %187, %189 : vector<8x128xf32>
    %c0_48 = arith.constant 0 : index
    %c0_49 = arith.constant 0 : index
    %191 = vector.load %arg7[%c0_48, %c0_49] : memref<8x128xf32, #tpu.memory_space<vmem>>, vector<8x128xf32>
    tpu.vector_store %arg7[%c0_48, %c0_49], %190 {strides = array<i32>} : memref<8x128xf32, #tpu.memory_space<vmem>>, vector<8x128xf32>,
    return
  }
  func.func @transform_0(%arg0: i32) -> (i32, i32) {
    %c0_i32 = arith.constant 0 : i32
    %c0_i32_0 = arith.constant 0 : i32
    %c0_i32_1 = arith.constant 0 : i32
    return %c0_i32, %c0_i32_0 : i32, i32
  }
  func.func @transform_1(%arg0: i32) -> (i32, i32) {
    %c0_i32 = arith.constant 0 : i32
    %c0_i32_0 = arith.constant 0 : i32
    %c0_i32_1 = arith.constant 0 : i32
    return %c0_i32, %c0_i32_0 : i32, i32
  }
  func.func @transform_2(%arg0: i32) -> (i32, i32) {
    %c0_i32 = arith.constant 0 : i32
    %c0_i32_0 = arith.constant 0 : i32
    %c0_i32_1 = arith.constant 0 : i32
    return %c0_i32, %c0_i32_0 : i32, i32
  }
  func.func @transform_3(%arg0: i32) -> (i32, i32) {
    %c0_i32 = arith.constant 0 : i32
    %c0_i32_0 = arith.constant 0 : i32
    %c0_i32_1 = arith.constant 0 : i32
    return %c0_i32, %c0_i32_0 : i32, i32
  }
  func.func @transform_4(%arg0: i32) -> (i32, i32) {
    %c0_i32 = arith.constant 0 : i32
    %c0_i32_0 = arith.constant 0 : i32
    %c0_i32_1 = arith.constant 0 : i32
    return %c0_i32, %c0_i32_0 : i32, i32
  }
  func.func @transform_5(%arg0: i32) -> (i32, i32) {
    %c0_i32 = arith.constant 0 : i32
    %c0_i32_0 = arith.constant 0 : i32
    %c0_i32_1 = arith.constant 0 : i32
    return %c0_i32, %c0_i32_0 : i32, i32
  }
  func.func @transform_6(%arg0: i32) -> (i32, i32) {
    %c0_i32 = arith.constant 0 : i32
    %c0_i32_0 = arith.constant 0 : i32
    %c0_i32_1 = arith.constant 0 : i32
    return %c0_i32, %c0_i32_0 : i32, i32
  }
}

</mosaic_0001>

<bundles_post_ra>
// kernel: rnn_forward.1
= control target key start
LH: loop header
LB: loop body
LE: loop exit
PB: predicated region body
PF: predicated region fallthrough
CT: control target
= control target key end

     0   :  { %11 = vsyncpa [#allocation4], 0  ;;  %s1985_s0 = inlined_call_operand.vmem [shape: f32[64,28], index: 0, kind: input, shape index: {}]   ;;  %s1986_s1 = inlined_call_operand.vmem [shape: f32[28,256], index: 1, kind: input, shape index: {}]   ;;  %s1987_s2 = inlined_call_operand.hbm [shape: f32[64,256], index: 2, kind: input, shape index: {}]   ;;  %s1988_s3 = inlined_call_operand.vmem [shape: f32[1,256], index: 3, kind: input, shape index: {}]   ;;  %s1989_s4 = inlined_call_operand.vmem [shape: f32[64,128], index: 4, kind: input, shape index: {}]   ;;  %s1990_s5 = inlined_call_operand.hbm [shape: f32[1,128], index: 5, kind: input, shape index: {}]   ;;  %s1991_s6 = inlined_call_operand.vmem [shape: f32[8,128], index: 6, kind: output, shape index: {}]  }
   0x1   :  { %12 = vsyncpa [#allocation6], 0  ;;  %s1643_s21 = smov [#allocation3]   ;;  %s1595_s25 = scalar_lea.hbm %s1987_s2, 2048 }
   0x2   :  { %s22_s22 = sshll.u32 %s1643_s21, 4  ;;  %p1596_p0 = scmp.ne.s32.totalorder %s1987_s2, %s1595_s25  ;;  %s23_s22 = int_to_ptr.vmem [resolvable:$true] %s22_s22 }
   0x3   :  { %p1599_p1 = scmp.lt.u32.totalorder %s1595_s25, %s1987_s2 }
   0x5   :  { %p1601_p2 = pnand %p1599_p1, %p1596_p0 }
   0x7   :  { %1604 = shalt.err (!%p1601_p2)
}
   0x8   :  { %s1605_s30 = scalar_lea.vmem %s23_s22, 2048  ;;  %p1610_p4 = scmp.lt.s32.totalorder %s23_s22, %s23_s22 }
   0x9   :  { %p1606_p3 = scmp.ne.s32.totalorder %s23_s22, %s1605_s30  ;;  %p1611_p5 = scmp.lt.s32.totalorder %s1605_s30, %s1605_s30 }
   0xb   :  { %p1612_p6 = por %p1611_p5, %p1610_p4 }
   0xd   :  { %p1613_p7 = pnand %p1612_p6, %p1606_p3 }
   0xf   :  { %1616 = shalt.err (!%p1613_p7)
}
  0x10   :  { %s1644_s7 = smov 256   ;;  %s1645_s8 = smov 16  }
  0x11   :  { %28 = dma.hbm_to_vmem [thread:$0]  %s1987_s2, 2048, %s23_s22, [#allocation4], %s1644_s7, %s1644_s7, %s1645_s8  }
  0x12   :  { %s1646_s11 = smov [#allocation5]   ;;  %s1617_s15 = scalar_lea.hbm %s1990_s5, 16 }
  0x13   :  { %s39_s12 = sshll.u32 %s1646_s11, 4  ;;  %p1618_p8 = scmp.ne.s32.totalorder %s1990_s5, %s1617_s15  ;;  %s40_s12 = int_to_ptr.vmem [resolvable:$true] %s39_s12 }
  0x14   :  { %p1621_p9 = scmp.lt.u32.totalorder %s1617_s15, %s1990_s5 }
  0x16   :  { %p1623_p10 = pnand %p1621_p9, %p1618_p8 }
  0x18   :  { %1626 = shalt.err (!%p1623_p10)
}
  0x19   :  { %s1627_s20 = scalar_lea.vmem %s40_s12, 16  ;;  %s1631_s2 = scalar_lea.vmem %s40_s12, 32 }
  0x1a   :  { %p1628_p11 = scmp.ne.s32.totalorder %s40_s12, %s1627_s20  ;;  %p1632_p12 = scmp.lt.s32.totalorder %s40_s12, %s40_s12 }
  0x1b   :  { %p1633_p13 = scmp.lt.s32.totalorder %s1631_s2, %s1627_s20 }
  0x1d   :  { %p1634_p0 = por %p1633_p13, %p1632_p12 }
  0x1f   :  { %p1635_p1 = pnand %p1634_p0, %p1628_p11 }
  0x21   :  { %1638 = shalt.err (!%p1635_p1)
}
  0x22   :  { %42 = dma.hbm_to_vmem [thread:$0]  %s1990_s5, 16, %s40_s12, [#allocation6]  }
  0x23   :  { %1639 = dma.done.wait [#allocation4], 2048  }
  0x24   :  { %1640 = vsyncadd [#allocation4], 4294965248 }
  0x25   :  { %1641 = dma.done.wait [#allocation6], 16  }
  0x26   :  { %1642 = vsyncadd [#allocation6], 4294967280  ;;  %v1647_v0 = vmov 0.0   ;;  %vm102_vm0 = vcmask 1043456   ;;  %v58_v1 = vld [vmem:[%s1986_s1 + $0x8] sm:$0xff]  ;;  %v60_v2 = vld [vmem:[%s1986_s1 + $0x18] sm:$0xff]  ;;  %v67_v50 = vlaneseq }
  0x27   :  { %173 = vmatprep.mubr.f32.mxu1 %v1647_v0  ;;  %660 = vmatprep.mubr.f32.mxu0 %v1647_v0  ;;  %v57_v3 = vld [vmem:[%s1986_s1] sm:$0xff]  ;;  %v1308_v4 = vpack.c.bf16 %v60_v2, %v58_v1  ;;  %v59_v5 = vld [vmem:[%s1986_s1 + $0x10] sm:$0xff]  ;;  %v62_v6 = vld [vmem:[%s1986_s1 + $0x28] sm:$0xff]  ;;  %vm1648_vm1 = vmmov 1   ;;  %vm77_vm3 = vcmask 228352   ;;  %s1649_s28 = smov 64  }
  0x28   :  { %v64_v7 = vld [vmem:[%s1986_s1 + $0x38] sm:$0xf]  ;;  %v1310_v8 = vpack.c.bf16 %v59_v5, %v57_v3  ;;  %vm1731_vm2 = vmpackc.low %vm102_vm0, %vm1648_vm1  ;;  %v61_v11 = vld [vmem:[%s1986_s1 + $0x20] sm:$0xff]  ;;  %v68_v53 = vshrl.u32 %v67_v50, 7  ;;  %vm259_vm4 = vcmask 523264   ;;  %vm1651_vm5 = vmmov 0  }
  0x29   :  { %v1312_v9 = vpack.c.bf16 %v64_v7, %v62_v6  ;;  %v63_v12 = vld [vmem:[%s1986_s1 + $0x30] sm:$0xf]  ;;  %1309 = vmatprep.subr.bf16.mxu1 %v1308_v4  ;;  %v239_v13 = vld [vmem:[#allocation3 + $0x8] sm:$0xff]  ;;  %v241_v14 = vld [vmem:[#allocation3 + $0x18] sm:$0xff] }
  0x2a   :  { %v238_v15 = vld [vmem:[#allocation3] sm:$0xff]  ;;  %1311 = vmatpush1.bf16.msra.mxu1 %v1310_v8  ;;  %v1315_v16 = vpack.c.bf16 %v63_v12, %v61_v11  ;;  %v1741_v17 = vpack.c.bf16 %v241_v14, %v239_v13  ;;  %v240_v18 = vld [vmem:[#allocation3 + $0x10] sm:$0xff]  ;;  %v243_v20 = vld [vmem:[#allocation3 + $0x28] sm:$0xff]  ;;  %v73_v56 = vsub.s32 1, %v68_v53  ;;  %v69_v2 = vsub.s32 0, %v68_v53 }
  0x2b   :  { %1314 = vmatprep.subr.msk.bf16.mxu1 %vm1731_vm2, %v1312_v9  ;;  %v1745_v19 = vpack.c.bf16 %v240_v18, %v238_v15  ;;  %v245_v21 = vld [vmem:[#allocation3 + $0x38] sm:$0xff]  ;;  %v242_v23 = vld [vmem:[#allocation3 + $0x20] sm:$0xff]  ;;  %v244_v24 = vld [vmem:[#allocation3 + $0x30] sm:$0xff] }
  0x2c   :  { %v1747_v22 = vpack.c.bf16 %v245_v21, %v243_v20  ;;  %1367 = vmatprep.subr.bf16.mxu0 %v1741_v17  ;;  %v49_v25 = vld [vmem:[%s1985_s0] sm:$0xff]  ;;  %v247_v26 = vld [vmem:[#allocation3 + $0x48] sm:$0xff]  ;;  %v249_v27 = vld [vmem:[#allocation3 + $0x58] sm:$0xff]  ;;  %v1758_v28 = vpack.c.bf16 %v244_v24, %v242_v23 }
  0x2d   :  { %1369 = vmatpush1.bf16.msra.mxu0 %v1745_v19  ;;  %v246_v29 = vld [vmem:[#allocation3 + $0x40] sm:$0xff]  ;;  %v248_v30 = vld [vmem:[#allocation3 + $0x50] sm:$0xff]  ;;  %v1761_v31 = vpack.c.bf16 %v249_v27, %v247_v26  ;;  %v50_v32 = vld [vmem:[%s1985_s0 + $0x8] sm:$0xff] }
  0x2e   :  { %1317 = vmatpush1.bf16.msk.msra.mxu1 %vm1731_vm2, %v1315_v16  ;;  %1371 = vmatprep.subr.bf16.mxu0 %v1747_v22  ;;  %v251_v33 = vld [vmem:[#allocation3 + $0x68] sm:$0xff]  ;;  %v253_v34 = vld [vmem:[#allocation3 + $0x78] sm:$0xff]  ;;  %v1770_v35 = vpack.c.bf16 %v248_v30, %v246_v29  ;;  %v250_v36 = vld [vmem:[#allocation3 + $0x60] sm:$0xff] }
  0x2f   :  { %1319 = vmatprep.subr.bf16.mxu1 %v1741_v17  ;;  %v252_v37 = vld [vmem:[#allocation3 + $0x70] sm:$0xff]  ;;  %v1774_v38 = vpack.c.bf16 %v253_v34, %v251_v33  ;;  %v52_v41 = vld [vmem:[%s1985_s0 + $0x18] sm:$0xff]  ;;  %v53_v42 = vld [vmem:[%s1985_s0 + $0x20] sm:$0xff] }
  0x30   :  { %v51_v39 = vld [vmem:[%s1985_s0 + $0x10] sm:$0xff]  ;;  %v1783_v40 = vpack.c.bf16 %v252_v37, %v250_v36  ;;  %v54_v43 = vld [vmem:[%s1985_s0 + $0x28] sm:$0xff]  ;;  %v56_v45 = vld [vmem:[%s1985_s0 + $0x38] sm:$0xff] }
  0x31   :  { %1247 = vmatmul.mubr.msk.f32.vlgmr.msra.gmra.mrb[0].mxu1 %vm77_vm3, %v49_v25  ;;  %1373 = vmatpush1.bf16.msra.mxu0 %v1758_v28  ;;  %v55_v44 = vld [vmem:[%s1985_s0 + $0x30] sm:$0xff]  ;;  %v65_v58 = vld [vmem:[%s1988_s3] sm:$0x3] }
  0x32   :  { %1321 = vmatpush1.bf16.msra.mxu1 %v1745_v19  ;;  %179 = vmatprep.mubr.f32.mxu1 %v1647_v0  ;;  %v1852_v60 = vrot.slane %v65_v58, %v73_v56  ;;  %v1856_v3 = vrot.slane %v65_v58, %v69_v2 }
  0x33   :  { %1323 = vmatprep.subr.bf16.mxu1 %v1747_v22  ;;  %1375 = vmatprep.subr.bf16.mxu0 %v1761_v31 }
  0x35   :  { %1248 = vmatmul.mubr.msk.f32.gmra.mrb[2].mxu1 %vm77_vm3, %v50_v32  ;;  %1377 = vmatpush1.bf16.msra.mxu0 %v1770_v35 }
  0x36   :  { %185 = vmatprep.mubr.f32.mxu1 %v1647_v0  ;;  %1325 = vmatpush1.bf16.msra.mxu1 %v1758_v28 }
  0x37   :  { %1327 = vmatprep.subr.bf16.mxu1 %v1761_v31  ;;  %1379 = vmatprep.subr.bf16.mxu0 %v1774_v38 }
  0x39   :  { %1249 = vmatmul.mubr.msk.f32.gmra.mrb[4].mxu1 %vm77_vm3, %v51_v39  ;;  %1381 = vmatpush1.bf16.msra.mxu0 %v1783_v40 }
  0x3a   :  { %191 = vmatprep.mubr.f32.mxu1 %v1647_v0  ;;  %1329 = vmatpush1.bf16.msra.mxu1 %v1770_v35 }
  0x3b   :  { %1331 = vmatprep.subr.bf16.mxu1 %v1774_v38  ;;  %1383 = vmatprep.subr.bf16.mxu0 %v1741_v17 }
  0x3d   :  { %1250 = vmatmul.mubr.msk.f32.gmra.mrb[6].mxu1 %vm77_vm3, %v52_v41 }
  0x3e   :  { %197 = vmatprep.mubr.f32.mxu1 %v1647_v0  ;;  %1333 = vmatpush1.bf16.msra.mxu1 %v1783_v40 }
  0x3f   :  { %1335 = vmatprep.subr.bf16.mxu1 %v1741_v17 }
  0x41   :  { %1251 = vmatmul.mubr.msk.f32.gmra.mrb[8].mxu1 %vm77_vm3, %v53_v42 }
  0x42   :  { %203 = vmatprep.mubr.f32.mxu1 %v1647_v0 }
  0x45   :  { %1252 = vmatmul.mubr.msk.f32.gmra.mrb[10].mxu1 %vm77_vm3, %v54_v43 }
  0x46   :  { %209 = vmatprep.mubr.f32.mxu1 %v1647_v0 }
  0x49   :  { %1253 = vmatmul.mubr.msk.f32.gmra.mrb[12].mxu1 %vm77_vm3, %v55_v44 }
  0x4a   :  { %215 = vmatprep.mubr.f32.mxu1 %v1647_v0 }
  0x4d   :  { %1254 = vmatmul.mubr.msk.f32.gmra.mrb[14].mxu1 %vm77_vm3, %v56_v45 }
  0x4e   :  { %327 = vmatprep.mubr.f32.mxu1 %v1647_v0 }
  0x51   :  { %328 = vmatmul.mubr.f32.vlgmr.msra.gmra.mrb[0].mxu1 %v1647_v0 }
  0x52   :  { %1337 = vmatpush1.bf16.msra.mxu1 %v1745_v19  ;;  %438 = vmatprep.mubr.f32.mxu1 %v1647_v0 }
  0x53   :  { %1339 = vmatprep.subr.bf16.mxu1 %v1747_v22 }
  0x56   :  { %1341 = vmatpush1.bf16.msra.mxu1 %v1758_v28 }
  0x57   :  { %1343 = vmatprep.subr.bf16.mxu1 %v1761_v31 }
  0x5a   :  { %1345 = vmatpush1.bf16.msra.mxu1 %v1770_v35 }
  0x5b   :  { %1347 = vmatprep.subr.bf16.mxu1 %v1774_v38 }
  0x5e   :  { %1349 = vmatpush1.bf16.msra.mxu1 %v1783_v40 }
  0x5f   :  { %1351 = vmatprep.subr.bf16.mxu1 %v1741_v17 }
 0x110   :  { %v1829_v46 = vpop.f32.mrb[6].mxu1 }
 0x111   :  { %v1831_v47 = vpop.f32.mrb[7].mxu1 }
 0x114   :  { %v1833_v48 = vpop.f32.mrb[8].mxu1 }
 0x115   :  { %v1835_v49 = vpop.f32.mrb[9].mxu1 }
 0x118   :  { %v1837_v51 = vpop.f32.mrb[10].mxu1 }
 0x119   :  { %v1839_v52 = vpop.f32.mrb[11].mxu1 }
 0x11c   :  { %v1841_v54 = vpop.f32.mrb[12].mxu1 }
 0x11d   :  { %v1843_v55 = vpop.f32.mrb[13].mxu1 }
 0x120   :  { %v1845_v57 = vpop.f32.mrb[14].mxu1 }
 0x121   :  { %v1850_v59 = vpop.f32.mrb[15].mxu1 }
 0x124   :  { %v329_v61 = vpop.f32.mrb[0].mxu1 }
 0x125   :  { %v331_v62 = vpop.f32.mrb[1].mxu1  ;;  %v1458_v4 = vadd.f32 %v329_v61, %v1856_v3 }
 0x126   :  { %v1459_v63 = vadd.f32 %v331_v62, %v1852_v60 }
 0x127   :  { %v1255_v5 = vmul.f32 -1.442695, %v1458_v4 }
 0x128   :  { %1499 = vtanh.f32 %v1459_v63  ;;  %v1256_v15 = vmul.f32 -1.442695, %v1459_v63 }
 0x129   :  { %1501 = vpow2.f32 %v1255_v5 }
 0x132   :  { %v1500_v1 = vpop.eup %1499 }
 0x133   :  { %351 = vrot.lane.b32.xlu0 %v1500_v1, %s1649_s28  ;;  %v1502_v6 = vpop.eup %1501 }
 0x134   :  { %v342_v7 = vadd.f32 1.0, %v1502_v6 }
 0x136   :  { %1503 = vrcp.f32 %v342_v7 }
 0x140   :  { %v1504_v8 = vpop.eup %1503 }
 0x141   :  { %v349_v11 = vmul.f32 0.0, %v1504_v8 }
 0x1a5   :  { %v352_v9 = vpop.permute.xlu0 %351 }
 0x1a6   :  { %v354_v10 = vmul.f32 %v1504_v8, %v352_v9 }
 0x1a8   :  { %356 = vrot.lane.b32.xlu0 %v354_v10, %s1649_s28 }
 0x21a   :  { %v357_v12 = vpop.permute.xlu0 %356 }
 0x21b   :  { %v359_v13 = vadd.f32 %v357_v12, %v349_v11 }
 0x21d   :  { %1505 = vtanh.f32 %v359_v13 }
 0x21e   :  { %1507 = vpow2.f32 %v1256_v15 }
 0x227   :  { %v1506_v14 = vpop.eup %1505 }
 0x228   :  { %362 = vrot.lane.b32.xlu1 %v1506_v14, %s1649_s28  ;;  %v1508_v16 = vpop.eup %1507 }
 0x229   :  { %v343_v18 = vadd.f32 1.0, %v1508_v16 }
 0x22b   :  { %1509 = vrcp.f32 %v343_v18 }
 0x235   :  { %v1510_v20 = vpop.eup %1509 }
 0x29a   :  { %v363_v21 = vpop.permute.xlu1 %362 }
 0x29b   :  { %v365_v23 = vmul.f32 %v1510_v20, %v363_v21 }
 0x29d   :  { %1257 = vmatmul.mubr.msk.f32.vlgmr.msra.gmra.mrb[2].mxu1 %vm259_vm4, %v365_v23  ;;  %v194_v23 = vadd.f32 %v1829_v46, %v1856_v3 }
 0x29e   :  { %1353 = vmatpush1.bf16.msra.mxu1 %v1745_v19  ;;  %549 = vmatprep.mubr.f32.mxu1 %v1647_v0 }
 0x29f   :  { %1355 = vmatprep.subr.bf16.mxu1 %v1747_v22 }
 0x2a2   :  { %1357 = vmatpush1.bf16.msra.mxu1 %v1758_v28 }
 0x2a3   :  { %1359 = vmatprep.subr.bf16.mxu1 %v1761_v31 }
 0x2a6   :  { %1361 = vmatpush1.bf16.msra.mxu1 %v1770_v35 }
 0x2a7   :  { %1363 = vmatprep.subr.bf16.mxu1 %v1774_v38 }
 0x2aa   :  { %1365 = vmatpush1.bf16.msra.mxu1 %v1783_v40 }
 0x370   :  { %v440_v24 = vpop.f32.mrb[2].mxu1 }
 0x371   :  { %v442_v25 = vpop.f32.mrb[3].mxu1  ;;  %v1460_v29 = vadd.f32 %v440_v24, %v1856_v3  ;;  %v196_v24 = vadd.f32 %v1831_v47, %v1852_v60 }
 0x372   :  { %v1461_v26 = vadd.f32 %v442_v25, %v1852_v60 }
 0x373   :  { %v1258_v30 = vmul.f32 -1.442695, %v1460_v29 }
 0x374   :  { %1511 = vtanh.f32 %v1461_v26  ;;  %v1259_v44 = vmul.f32 -1.442695, %v1461_v26 }
 0x375   :  { %1513 = vpow2.f32 %v1258_v30 }
 0x37e   :  { %v1512_v27 = vpop.eup %1511 }
 0x37f   :  { %462 = vrot.lane.b32.xlu1 %v1512_v27, %s1649_s28  ;;  %v1514_v32 = vpop.eup %1513 }
 0x380   :  { %v453_v33 = vadd.f32 1.0, %v1514_v32 }
 0x382   :  { %1515 = vrcp.f32 %v453_v33 }
 0x38c   :  { %v1516_v34 = vpop.eup %1515 }
 0x38d   :  { %v460_v39 = vmul.f32 %v1516_v34, %v359_v13 }
 0x3f1   :  { %v463_v36 = vpop.permute.xlu1 %462 }
 0x3f2   :  { %v465_v37 = vmul.f32 %v1516_v34, %v463_v36 }
 0x3f4   :  { %467 = vrot.lane.b32.xlu0 %v465_v37, %s1649_s28 }
 0x466   :  { %v468_v41 = vpop.permute.xlu0 %467 }
 0x467   :  { %v470_v42 = vadd.f32 %v468_v41, %v460_v39 }
 0x469   :  { %1517 = vtanh.f32 %v470_v42 }
 0x46a   :  { %1519 = vpow2.f32 %v1259_v44 }
 0x473   :  { %v1518_v43 = vpop.eup %1517 }
 0x474   :  { %473 = vrot.lane.b32.xlu1 %v1518_v43, %s1649_s28  ;;  %v1520_v45 = vpop.eup %1519 }
 0x475   :  { %v454_v50 = vadd.f32 1.0, %v1520_v45 }
 0x477   :  { %1521 = vrcp.f32 %v454_v50 }
 0x481   :  { %v1522_v53 = vpop.eup %1521 }
 0x4e6   :  { %v474_v56 = vpop.permute.xlu1 %473 }
 0x4e7   :  { %v476_v58 = vmul.f32 %v1522_v53, %v474_v56 }
 0x4e9   :  { %1260 = vmatmul.mubr.msk.f32.vlgmr.msra.gmra.mrb[4].mxu1 %vm259_vm4, %v476_v58  ;;  %v200_v58 = vadd.f32 %v1833_v48, %v1856_v3 }
 0x4ea   :  { %1305 = vmatprep.mubr.msk.f32.mxu1 %vm1651_vm5, %v1647_v0 }
 0x5bc   :  { %v551_v61 = vpop.f32.mrb[4].mxu1 }
 0x5bd   :  { %v553_v62 = vpop.f32.mrb[5].mxu1  ;;  %v1462_v2 = vadd.f32 %v551_v61, %v1856_v3  ;;  %v202_v61 = vadd.f32 %v1835_v49, %v1852_v60 }
 0x5be   :  { %v1463_v63 = vadd.f32 %v553_v62, %v1852_v60 }
 0x5bf   :  { %v1261_v4 = vmul.f32 -1.442695, %v1462_v2 }
 0x5c0   :  { %1523 = vtanh.f32 %v1463_v63  ;;  %v1262_v14 = vmul.f32 -1.442695, %v1463_v63 }
 0x5c1   :  { %1525 = vpow2.f32 %v1261_v4 }
 0x5ca   :  { %v1524_v1 = vpop.eup %1523 }
 0x5cb   :  { %573 = vrot.lane.b32.xlu0 %v1524_v1, %s1649_s28  ;;  %v1526_v5 = vpop.eup %1525 }
 0x5cc   :  { %v564_v6 = vadd.f32 1.0, %v1526_v5 }
 0x5ce   :  { %1527 = vrcp.f32 %v564_v6 }
 0x5d8   :  { %v1528_v7 = vpop.eup %1527 }
 0x5d9   :  { %v571_v10 = vmul.f32 %v1528_v7, %v470_v42 }
 0x63d   :  { %v574_v8 = vpop.permute.xlu0 %573 }
 0x63e   :  { %v576_v9 = vmul.f32 %v1528_v7, %v574_v8 }
 0x640   :  { %578 = vrot.lane.b32.xlu1 %v576_v9, %s1649_s28 }
 0x6b2   :  { %v579_v11 = vpop.permute.xlu1 %578 }
 0x6b3   :  { %v581_v12 = vadd.f32 %v579_v11, %v571_v10 }
 0x6b5   :  { %1529 = vtanh.f32 %v581_v12 }
 0x6b6   :  { %1531 = vpow2.f32 %v1262_v14 }
 0x6bf   :  { %v1530_v13 = vpop.eup %1529 }
 0x6c0   :  { %584 = vrot.lane.b32.xlu0 %v1530_v13, %s1649_s28  ;;  %v1532_v15 = vpop.eup %1531 }
 0x6c1   :  { %v565_v16 = vadd.f32 1.0, %v1532_v15 }
 0x6c3   :  { %1533 = vrcp.f32 %v565_v16 }
 0x6cd   :  { %v1534_v18 = vpop.eup %1533 }
 0x732   :  { %v585_v20 = vpop.permute.xlu0 %584 }
 0x733   :  { %v587_v21 = vmul.f32 %v1534_v18, %v585_v20 }
 0x735   :  { %1263 = vmatmul.mubr.msk.f32.vlgmr.msra.gmra.mrb[0].mxu0 %vm259_vm4, %v587_v21  ;;  %v206_v21 = vadd.f32 %v1837_v51, %v1856_v3 }
 0x736   :  { %1385 = vmatpush1.bf16.msra.mxu0 %v1745_v19  ;;  %771 = vmatprep.mubr.f32.mxu0 %v1647_v0 }
 0x737   :  { %1387 = vmatprep.subr.bf16.mxu0 %v1747_v22 }
 0x73a   :  { %1389 = vmatpush1.bf16.msra.mxu0 %v1758_v28 }
 0x73b   :  { %1391 = vmatprep.subr.bf16.mxu0 %v1761_v31 }
 0x73e   :  { %1393 = vmatpush1.bf16.msra.mxu0 %v1770_v35 }
 0x73f   :  { %1395 = vmatprep.subr.bf16.mxu0 %v1774_v38 }
 0x742   :  { %1397 = vmatpush1.bf16.msra.mxu0 %v1783_v40 }
 0x743   :  { %1399 = vmatprep.subr.bf16.mxu0 %v1741_v17 }
 0x808   :  { %v662_v25 = vpop.f32.mrb[0].mxu0 }
 0x809   :  { %v667_v26 = vadd.f32 %v662_v25, %v194_v23  ;;  %v664_v27 = vpop.f32.mrb[1].mxu0  ;;  %v208_v23 = vadd.f32 %v1839_v52, %v1852_v60 }
 0x80a   :  { %v668_v29 = vadd.f32 %v664_v27, %v196_v24 }
 0x80b   :  { %v1264_v32 = vmul.f32 -1.442695, %v667_v26 }
 0x80c   :  { %1535 = vtanh.f32 %v668_v29  ;;  %v1265_v43 = vmul.f32 -1.442695, %v668_v29 }
 0x80d   :  { %1537 = vpow2.f32 %v1264_v32 }
 0x816   :  { %v1536_v30 = vpop.eup %1535 }
 0x817   :  { %684 = vrot.lane.b32.xlu1 %v1536_v30, %s1649_s28  ;;  %v1538_v33 = vpop.eup %1537 }
 0x818   :  { %v675_v34 = vadd.f32 1.0, %v1538_v33 }
 0x81a   :  { %1539 = vrcp.f32 %v675_v34 }
 0x824   :  { %v1540_v36 = vpop.eup %1539 }
 0x825   :  { %v682_v46 = vmul.f32 %v1540_v36, %v581_v12 }
 0x889   :  { %v685_v37 = vpop.permute.xlu1 %684 }
 0x88a   :  { %v687_v39 = vmul.f32 %v1540_v36, %v685_v37 }
 0x88c   :  { %689 = vrot.lane.b32.xlu0 %v687_v39, %s1649_s28 }
 0x8fe   :  { %v690_v47 = vpop.permute.xlu0 %689 }
 0x8ff   :  { %v692_v41 = vadd.f32 %v690_v47, %v682_v46 }
 0x901   :  { %1541 = vtanh.f32 %v692_v41 }
 0x902   :  { %1543 = vpow2.f32 %v1265_v43 }
 0x90b   :  { %v1542_v42 = vpop.eup %1541 }
 0x90c   :  { %695 = vrot.lane.b32.xlu1 %v1542_v42, %s1649_s28  ;;  %v1544_v44 = vpop.eup %1543 }
 0x90d   :  { %v676_v45 = vadd.f32 1.0, %v1544_v44 }
 0x90f   :  { %1545 = vrcp.f32 %v676_v45  ;;  %v212_v45 = vadd.f32 %v1841_v54, %v1856_v3 }
 0x919   :  { %v1546_v50 = vpop.eup %1545 }
 0x97e   :  { %v696_v53 = vpop.permute.xlu1 %695 }
 0x97f   :  { %v698_v56 = vmul.f32 %v1546_v50, %v696_v53 }
 0x981   :  { %1266 = vmatmul.mubr.msk.f32.vlgmr.msra.gmra.mrb[2].mxu0 %vm259_vm4, %v698_v56 }
 0x982   :  { %1401 = vmatpush1.bf16.msra.mxu0 %v1745_v19  ;;  %882 = vmatprep.mubr.f32.mxu0 %v1647_v0 }
 0x983   :  { %1403 = vmatprep.subr.bf16.mxu0 %v1747_v22 }
 0x986   :  { %1405 = vmatpush1.bf16.msra.mxu0 %v1758_v28 }
 0x987   :  { %1407 = vmatprep.subr.bf16.mxu0 %v1761_v31 }
 0x98a   :  { %1409 = vmatpush1.bf16.msra.mxu0 %v1770_v35 }
 0x98b   :  { %1411 = vmatprep.subr.bf16.mxu0 %v1774_v38 }
 0x98e   :  { %1413 = vmatpush1.bf16.msra.mxu0 %v1783_v40 }
 0x98f   :  { %1415 = vmatprep.subr.bf16.mxu0 %v1741_v17 }
 0xa54   :  { %v773_v62 = vpop.f32.mrb[2].mxu0 }
 0xa55   :  { %v778_v63 = vadd.f32 %v773_v62, %v200_v58  ;;  %v775_v1 = vpop.f32.mrb[3].mxu0 }
 0xa56   :  { %v779_v2 = vadd.f32 %v775_v1, %v202_v61 }
 0xa57   :  { %v1267_v5 = vmul.f32 -1.442695, %v778_v63 }
 0xa58   :  { %1547 = vtanh.f32 %v779_v2  ;;  %v1268_v13 = vmul.f32 -1.442695, %v779_v2 }
 0xa59   :  { %1549 = vpow2.f32 %v1267_v5 }
 0xa62   :  { %v1548_v4 = vpop.eup %1547 }
 0xa63   :  { %795 = vrot.lane.b32.xlu0 %v1548_v4, %s1649_s28  ;;  %v1550_v6 = vpop.eup %1549 }
 0xa64   :  { %v786_v7 = vadd.f32 1.0, %v1550_v6 }
 0xa66   :  { %1551 = vrcp.f32 %v786_v7 }
 0xa70   :  { %v1552_v8 = vpop.eup %1551 }
 0xa71   :  { %v793_v48 = vmul.f32 %v1552_v8, %v692_v41 }
 0xad5   :  { %v796_v9 = vpop.permute.xlu0 %795 }
 0xad6   :  { %v798_v10 = vmul.f32 %v1552_v8, %v796_v9  ;;  %v218_v8 = vadd.f32 %v1845_v57, %v1856_v3  ;;  %v220_v9 = vadd.f32 %v1850_v59, %v1852_v60  ;;  %v1143_v57 = vld [vmem:[%s1989_s4] sm:$0xff]  ;;  %v1144_v59 = vld [vmem:[%s1989_s4 + $0x8] sm:$0xff]  ;;  %v1650_v3 = vmov 0.0|0.0  }
 0xad7   :  { %1446 = vmatprep.subr.bf16.mxu1 %v1650_v3 }
 0xad8   :  { %800 = vrot.lane.b32.xlu1 %v798_v10, %s1649_s28 }
 0xb4a   :  { %v801_v49 = vpop.permute.xlu1 %800 }
 0xb4b   :  { %v803_v11 = vadd.f32 %v801_v49, %v793_v48 }
 0xb4d   :  { %1553 = vtanh.f32 %v803_v11 }
 0xb4e   :  { %1555 = vpow2.f32 %v1268_v13 }
 0xb57   :  { %v1554_v12 = vpop.eup %1553 }
 0xb58   :  { %806 = vrot.lane.b32.xlu0 %v1554_v12, %s1649_s28  ;;  %v1556_v14 = vpop.eup %1555 }
 0xb59   :  { %v787_v15 = vadd.f32 1.0, %v1556_v14 }
 0xb5b   :  { %1557 = vrcp.f32 %v787_v15 }
 0xb65   :  { %v1558_v16 = vpop.eup %1557 }
 0xbca   :  { %v807_v18 = vpop.permute.xlu0 %806 }
 0xbcb   :  { %v809_v20 = vmul.f32 %v1558_v16, %v807_v18 }
 0xbcd   :  { %1269 = vmatmul.mubr.msk.f32.vlgmr.msra.gmra.mrb[4].mxu0 %vm259_vm4, %v809_v20 }
 0xbce   :  { %1417 = vmatpush1.bf16.msra.mxu0 %v1745_v19  ;;  %993 = vmatprep.mubr.f32.mxu0 %v1647_v0 }
 0xbcf   :  { %1419 = vmatprep.subr.bf16.mxu0 %v1747_v22 }
 0xbd2   :  { %1421 = vmatpush1.bf16.msra.mxu0 %v1758_v28 }
 0xbd3   :  { %1423 = vmatprep.subr.bf16.mxu0 %v1761_v31 }
 0xbd6   :  { %1425 = vmatpush1.bf16.msra.mxu0 %v1770_v35 }
 0xbd7   :  { %1427 = vmatprep.subr.bf16.mxu0 %v1774_v38 }
 0xbda   :  { %1429 = vmatpush1.bf16.msra.mxu0 %v1783_v40 }
 0xbdb   :  { %1431 = vmatprep.subr.bf16.mxu0 %v1741_v17 }
 0xca0   :  { %v884_v24 = vpop.f32.mrb[4].mxu0 }
 0xca1   :  { %v889_v25 = vadd.f32 %v884_v24, %v206_v21  ;;  %v886_v26 = vpop.f32.mrb[5].mxu0  ;;  %v1447_v21 = vpack.c.bf16 %v1144_v59, %v1143_v57 }
 0xca2   :  { %v890_v27 = vadd.f32 %v886_v26, %v208_v23  ;;  %v1146_v23 = vld [vmem:[%s1989_s4 + $0x18] sm:$0xff]  ;;  %v1148_v26 = vld [vmem:[%s1989_s4 + $0x28] sm:$0xff] }
 0xca3   :  { %v1270_v30 = vmul.f32 -1.442695, %v889_v25  ;;  %1448 = vmatpush3.bf16.msra.mxu1 %v1447_v21  ;;  %v1147_v25 = vld [vmem:[%s1989_s4 + $0x20] sm:$0xff] }
 0xca4   :  { %1559 = vtanh.f32 %v890_v27  ;;  %v1271_v46 = vmul.f32 -1.442695, %v890_v27  ;;  %1449 = vmatprep.subr.bf16.mxu1 %v1650_v3  ;;  %v1453_v27 = vpack.c.bf16 %v1148_v26, %v1147_v25 }
 0xca5   :  { %1561 = vpow2.f32 %v1270_v30  ;;  %v1150_v30 = vld [vmem:[%s1989_s4 + $0x38] sm:$0xff] }
 0xcae   :  { %v1560_v29 = vpop.eup %1559 }
 0xcaf   :  { %906 = vrot.lane.b32.xlu1 %v1560_v29, %s1649_s28  ;;  %v1562_v32 = vpop.eup %1561  ;;  %v1149_v29 = vld [vmem:[%s1989_s4 + $0x30] sm:$0xff] }
 0xcb0   :  { %v897_v33 = vadd.f32 1.0, %v1562_v32  ;;  %v1456_v32 = vpack.c.bf16 %v1150_v30, %v1149_v29 }
 0xcb2   :  { %1563 = vrcp.f32 %v897_v33 }
 0xcbc   :  { %v1564_v17 = vpop.eup %1563 }
 0xcbd   :  { %v904_v51 = vmul.f32 %v1564_v17, %v803_v11 }
 0xd21   :  { %v907_v34 = vpop.permute.xlu1 %906 }
 0xd22   :  { %v909_v36 = vmul.f32 %v1564_v17, %v907_v34 }
 0xd24   :  { %911 = vrot.lane.b32.xlu0 %v909_v36, %s1649_s28 }
 0xd96   :  { %v912_v52 = vpop.permute.xlu0 %911 }
 0xd97   :  { %v914_v37 = vadd.f32 %v912_v52, %v904_v51 }
 0xd99   :  { %1565 = vtanh.f32 %v914_v37 }
 0xd9a   :  { %1567 = vpow2.f32 %v1271_v46 }
 0xda3   :  { %v1566_v39 = vpop.eup %1565 }
 0xda4   :  { %917 = vrot.lane.b32.xlu1 %v1566_v39, %s1649_s28  ;;  %v1568_v47 = vpop.eup %1567 }
 0xda5   :  { %v898_v41 = vadd.f32 1.0, %v1568_v47 }
 0xda7   :  { %1569 = vrcp.f32 %v898_v41  ;;  %v1278_v41 = vld [vmem:[#allocation5] ss:$0 sm:$0xff] }
 0xdb1   :  { %v1570_v42 = vpop.eup %1569 }
 0xe16   :  { %v918_v43 = vpop.permute.xlu1 %917 }
 0xe17   :  { %v920_v44 = vmul.f32 %v1570_v42, %v918_v43 }
 0xe19   :  { %1272 = vmatmul.mubr.msk.f32.vlgmr.msra.gmra.mrb[6].mxu0 %vm259_vm4, %v920_v44 }
 0xe1a   :  { %1433 = vmatpush1.bf16.msra.mxu0 %v1745_v19  ;;  %1104 = vmatprep.mubr.f32.mxu0 %v1647_v0  ;;  %v214_v19 = vadd.f32 %v1843_v55, %v1852_v60  ;;  %v1145_v60 = vld [vmem:[%s1989_s4 + $0x10] sm:$0xff] }
 0xe1b   :  { %1435 = vmatprep.subr.bf16.mxu0 %v1747_v22  ;;  %v1450_v24 = vpack.c.bf16 %v1146_v23, %v1145_v60 }
 0xe1d   :  { %1451 = vmatpush3.bf16.msra.mxu1 %v1450_v24 }
 0xe1e   :  { %1437 = vmatpush1.bf16.msra.mxu0 %v1758_v28  ;;  %1452 = vmatprep.subr.bf16.mxu1 %v1650_v3 }
 0xe1f   :  { %1439 = vmatprep.subr.bf16.mxu0 %v1761_v31 }
 0xe21   :  { %1454 = vmatpush3.bf16.msra.mxu1 %v1453_v27 }
 0xe22   :  { %1441 = vmatpush1.bf16.msra.mxu0 %v1770_v35  ;;  %1455 = vmatprep.subr.bf16.mxu1 %v1650_v3 }
 0xe23   :  { %1443 = vmatprep.subr.bf16.mxu0 %v1774_v38 }
 0xe25   :  { %1457 = vmatpush3.bf16.msra.mxu1 %v1456_v32 }
 0xe26   :  { %1445 = vmatpush1.bf16.msra.mxu0 %v1783_v40 }
 0xeec   :  { %v995_v50 = vpop.f32.mrb[6].mxu0 }
 0xeed   :  { %v1000_v53 = vadd.f32 %v995_v50, %v212_v45  ;;  %v997_v56 = vpop.f32.mrb[7].mxu0 }
 0xeee   :  { %v1001_v22 = vadd.f32 %v997_v56, %v214_v19 }
 0xeef   :  { %v1273_v31 = vmul.f32 -1.442695, %v1000_v53 }
 0xef0   :  { %1571 = vtanh.f32 %v1001_v22  ;;  %v1274_v1 = vmul.f32 -1.442695, %v1001_v22 }
 0xef1   :  { %1573 = vpow2.f32 %v1273_v31 }
 0xefa   :  { %v1572_v28 = vpop.eup %1571 }
 0xefb   :  { %1017 = vrot.lane.b32.xlu0 %v1572_v28, %s1649_s28  ;;  %v1574_v35 = vpop.eup %1573 }
 0xefc   :  { %v1008_v38 = vadd.f32 1.0, %v1574_v35 }
 0xefe   :  { %1575 = vrcp.f32 %v1008_v38 }
 0xf08   :  { %v1576_v40 = vpop.eup %1575 }
 0xf09   :  { %v1015_v54 = vmul.f32 %v1576_v40, %v914_v37 }
 0xf6d   :  { %v1018_v58 = vpop.permute.xlu0 %1017 }
 0xf6e   :  { %v1020_v61 = vmul.f32 %v1576_v40, %v1018_v58 }
 0xf70   :  { %1022 = vrot.lane.b32.xlu1 %v1020_v61, %s1649_s28 }
 0xfe2   :  { %v1023_v55 = vpop.permute.xlu1 %1022 }
 0xfe3   :  { %v1025_v62 = vadd.f32 %v1023_v55, %v1015_v54 }
 0xfe5   :  { %1577 = vtanh.f32 %v1025_v62 }
 0xfe6   :  { %1579 = vpow2.f32 %v1274_v1 }
 0xfef   :  { %v1578_v63 = vpop.eup %1577 }
 0xff0   :  { %1028 = vrot.lane.b32.xlu0 %v1578_v63, %s1649_s28  ;;  %v1580_v2 = vpop.eup %1579 }
 0xff1   :  { %v1009_v4 = vadd.f32 1.0, %v1580_v2 }
 0xff3   :  { %1581 = vrcp.f32 %v1009_v4 }
 0xffd   :  { %v1582_v5 = vpop.eup %1581 }
0x1062   :  { %v1029_v6 = vpop.permute.xlu0 %1028 }
0x1063   :  { %v1031_v7 = vmul.f32 %v1582_v5, %v1029_v6 }
0x1065   :  { %1275 = vmatmul.mubr.msk.f32.vlgmr.msra.gmra.mrb[8].mxu0 %vm259_vm4, %v1031_v7 }
0x1138   :  { %v1106_v10 = vpop.f32.mrb[8].mxu0 }
0x1139   :  { %v1111_v48 = vadd.f32 %v1106_v10, %v218_v8  ;;  %v1108_v49 = vpop.f32.mrb[9].mxu0 }
0x113a   :  { %v1112_v11 = vadd.f32 %v1108_v49, %v220_v9 }
0x113b   :  { %v1276_v13 = vmul.f32 -1.442695, %v1111_v48 }
0x113c   :  { %1583 = vtanh.f32 %v1112_v11  ;;  %v1277_v51 = vmul.f32 -1.442695, %v1112_v11 }
0x113d   :  { %1585 = vpow2.f32 %v1276_v13 }
0x1146   :  { %v1584_v12 = vpop.eup %1583 }
0x1147   :  { %1128 = vrot.lane.b32.xlu1 %v1584_v12, %s1649_s28  ;;  %v1586_v14 = vpop.eup %1585 }
0x1148   :  { %v1119_v15 = vadd.f32 1.0, %v1586_v14 }
0x114a   :  { %1587 = vrcp.f32 %v1119_v15 }
0x1154   :  { %v1588_v16 = vpop.eup %1587 }
0x1155   :  { %v1126_v33 = vmul.f32 %v1588_v16, %v1025_v62 }
0x11b9   :  { %v1129_v18 = vpop.permute.xlu1 %1128 }
0x11ba   :  { %v1131_v20 = vmul.f32 %v1588_v16, %v1129_v18 }
0x11bc   :  { %1133 = vrot.lane.b32.xlu0 %v1131_v20, %s1649_s28 }
0x122e   :  { %v1134_v17 = vpop.permute.xlu0 %1133 }
0x122f   :  { %v1136_v34 = vadd.f32 %v1134_v17, %v1126_v33 }
0x1231   :  { %1589 = vtanh.f32 %v1136_v34 }
0x1232   :  { %1591 = vpow2.f32 %v1277_v51 }
0x123b   :  { %v1590_v36 = vpop.eup %1589 }
0x123c   :  { %1139 = vrot.lane.b32.xlu1 %v1590_v36, %s1649_s28  ;;  %v1592_v52 = vpop.eup %1591 }
0x123d   :  { %v1120_v37 = vadd.f32 1.0, %v1592_v52 }
0x123f   :  { %1593 = vrcp.f32 %v1120_v37 }
0x1249   :  { %v1594_v39 = vpop.eup %1593 }
0x12ae   :  { %v1140_v46 = vpop.permute.xlu1 %1139 }
0x12af   :  { %v1142_v47 = vmul.f32 %v1594_v39, %v1140_v46 }
0x12b1   :  { %1306 = vmatmul.mubr.msk.f32.vlgmr.msra.gmra.mrb[16].mxu1 %vm259_vm4, %v1142_v47 }
0x1384   :  { %v1227_v42 = vpop.f32.mrb[16].mxu1 }
0x1385   :  { %v1228_v43 = vadd.f32 %v1278_v41, %v1227_v42  ;;  %v1307_v44 = vpop.f32.mrb[17].mxu1 }
0x1387   :  { %1231 = vst [vmem:[%s1991_s6] sm:$0xff] %v1228_v43 }
0x1388   :  { %1236 = vsyncpa [#allocation4], 1 }
0x1389   :  { %1237 = vsyncpa [#allocation6], 1 }

</bundles_post_ra>
